<compile_context>
chip_gen: v7x
topology: tpu7x:2x2x1
jax: 0.10.0
libtpu: 0.0.40
codegen_flags: <defaults>
</compile_context>

<pallas_src>
import functools

import jax
import jax.numpy as jnp
from jax.experimental import pallas as pl
from jax.experimental.pallas import tpu as pltpu

HIDDEN = 10        # fixed by the module: nn.Linear(input_dim, 10)
HIDDEN_PAD = 128   # hidden dim zero-padded to one full lane width (exact)


def _policy_kernel(x_ref, w1_ref, w2_ref, o_ref):
    # x_ref : (tb, in_dim)           f32
    # w1_ref: (in_dim, HIDDEN_PAD)   f32  (= l1.weight.T, hidden axis zero-padded)
    # w2_ref: (HIDDEN_PAD, out_dim)  f32  (= l2.weight.T, hidden axis zero-padded)
    # o_ref : (tb, out_dim)          f32
    x = x_ref[...]

    # Linear(input_dim -> 10, no bias) + ReLU; padded hidden units are exactly 0.
    h = jnp.maximum(
        jnp.dot(x, w1_ref[...], preferred_element_type=jnp.float32), 0.0)

    # Linear(10 -> output_dim, no bias); zero-padded hidden rows contribute 0.
    logits = jnp.dot(h, w2_ref[...], preferred_element_type=jnp.float32)

    # Numerically stable softmax over the (true-width) last axis.
    m = jnp.max(logits, axis=-1, keepdims=True)
    e = jnp.exp(logits - m)
    denom = jnp.sum(e, axis=-1, keepdims=True)
    o_ref[...] = e / denom  # exact divide keeps row sums == 1 to ~1e-7


def prepare_policy_weights(w1, w2):
    """One-time layout prep (call outside the inference hot loop).

    w1: (HIDDEN, input_dim)   -- PyTorch l1.weight layout
    w2: (output_dim, HIDDEN)  -- PyTorch l2.weight layout
    Returns (w1t, w2t) with the hidden axis zero-padded to HIDDEN_PAD (exact).
    """
    hidden, in_dim = w1.shape
    out_dim = w2.shape[0]
    assert hidden == HIDDEN and w2.shape[1] == HIDDEN
    w1t = jnp.zeros((in_dim, HIDDEN_PAD), jnp.float32).at[:, :hidden].set(
        w1.astype(jnp.float32).T)
    w2t = jnp.zeros((HIDDEN_PAD, out_dim), jnp.float32).at[:hidden, :].set(
        w2.astype(jnp.float32).T)
    return w1t, w2t


@functools.partial(jax.jit, static_argnames=("block_b",))
def policy_forward(x, w1t, w2t, *, block_b=2048):
    """Policy forward: softmax(relu(x @ w1.T) @ w2.T, axis=-1).

    x  : (B, input_dim)            float32
    w1t: (input_dim, HIDDEN_PAD)   from prepare_policy_weights
    w2t: (HIDDEN_PAD, output_dim)  from prepare_policy_weights
    """
    assert block_b % 8 == 0 and block_b > 0
    B, in_dim = x.shape
    out_dim = w2t.shape[1]
    x = x.astype(jnp.float32)

    # One tile covering the whole batch if it fits (block dim == full array dim
    # is always legal), otherwise block_b-row tiles with a ragged final block
    # handled by Pallas (no host-side padding copy of x).
    tb = B if B <= block_b else block_b
    n_tiles = pl.cdiv(B, tb)

    return pl.pallas_call(
        _policy_kernel,
        out_shape=jax.ShapeDtypeStruct((B, out_dim), jnp.float32),
        grid=(n_tiles,),
        in_specs=[
            pl.BlockSpec((tb, in_dim), lambda i: (i, 0)),           # x tiles stream
            pl.BlockSpec((in_dim, HIDDEN_PAD), lambda i: (0, 0)),   # weights stay resident
            pl.BlockSpec((HIDDEN_PAD, out_dim), lambda i: (0, 0)),
        ],
        out_specs=pl.BlockSpec((tb, out_dim), lambda i: (i, 0)),    # narrow HBM writes
        compiler_params=pltpu.CompilerParams(
            # Independent batch tiles; shards across the 2 TCs on v7x.
            dimension_semantics=("parallel",),
        ),
    )(x, w1t, w2t)


if __name__ == "__main__":
    # Small shapes consistent with the module: input_dim=32, output_dim=8, batch=8.
    batch, input_dim, output_dim = 8, 32, 8

    key = jax.random.PRNGKey(0)
    kx, k1, k2, kx2 = jax.random.split(key, 4)

    # Deterministic init mimicking nn.Linear's uniform(-1/sqrt(fan_in), 1/sqrt(fan_in)).
    bound1 = 1.0 / jnp.sqrt(jnp.float32(input_dim))
    bound2 = 1.0 / jnp.sqrt(jnp.float32(HIDDEN))
    w1 = jax.random.uniform(k1, (HIDDEN, input_dim), jnp.float32, -bound1, bound1)
    w2 = jax.random.uniform(k2, (output_dim, HIDDEN), jnp.float32, -bound2, bound2)

    # One-time weight layout prep (hoisted out of the per-call path).
    w1t, w2t = prepare_policy_weights(w1, w2)

    x = jax.random.normal(kx, (batch, input_dim), jnp.float32)

    out = jax.block_until_ready(policy_forward(x, w1t, w2t))
    ref = jax.nn.softmax(jnp.maximum(x @ w1.T, 0.0) @ w2.T, axis=-1)
    assert out.shape == (batch, output_dim)
    assert jnp.allclose(out, ref, atol=1e-5, rtol=1e-5)
    assert jnp.allclose(jnp.sum(out, axis=-1), 1.0, atol=1e-5)

    # Exercise the multi-tile path with a ragged final block (300 = 2*128 + 44).
    big_batch = 300
    xb = jax.random.normal(kx2, (big_batch, input_dim), jnp.float32)
    ref_b = jax.nn.softmax(jnp.maximum(xb @ w1.T, 0.0) @ w2.T, axis=-1)

    out_b = jax.block_until_ready(policy_forward(xb, w1t, w2t, block_b=128))
    assert out_b.shape == (big_batch, output_dim)
    assert jnp.allclose(out_b, ref_b, atol=1e-5, rtol=1e-5)
    assert jnp.allclose(jnp.sum(out_b, axis=-1), 1.0, atol=1e-5)

    # Single-tile path where the block equals the full (non-multiple-of-8) batch.
    out_b1 = jax.block_until_ready(policy_forward(xb, w1t, w2t))
    assert jnp.allclose(out_b1, ref_b, atol=1e-5, rtol=1e-5)

    print("KERNEL_OK")
</pallas_src>

<mosaic_0001>
module attributes {stable_mosaic.version = 11 : i64} {
  func.func @_policy_kernel(%arg0: i32, %arg1: memref<8x32xf32, #tpu.memory_space<vmem>>, %arg2: memref<32x128xf32, #tpu.memory_space<vmem>>, %arg3: memref<128x8xf32, #tpu.memory_space<vmem>>, %arg4: memref<8x8xf32, #tpu.memory_space<vmem>>) attributes {dimension_semantics = [#tpu.dimension_semantics<parallel>], iteration_bounds = array<i64: 1>, scalar_prefetch = 0 : i64, scratch_operands = 0 : i64, tpu.core_type = #tpu.core_type<tc>, window_params = [{transform_indices = @transform_0, window_bounds = array<i64: 8, 32>}, {pipeline_mode = #tpu.pipeline_mode<synchronous>, transform_indices = @transform_1, window_bounds = array<i64: 32, 128>}, {pipeline_mode = #tpu.pipeline_mode<synchronous>, transform_indices = @transform_2, window_bounds = array<i64: 128, 8>}, {transform_indices = @transform_3, window_bounds = array<i64: 8, 8>}]} {
    %c0 = arith.constant 0 : index
    %c0_0 = arith.constant 0 : index
    %0 = vector.load %arg1[%c0, %c0_0] : memref<8x32xf32, #tpu.memory_space<vmem>>, vector<8x32xf32>
    %c0_1 = arith.constant 0 : index
    %c0_2 = arith.constant 0 : index
    %1 = vector.load %arg2[%c0_1, %c0_2] : memref<32x128xf32, #tpu.memory_space<vmem>>, vector<32x128xf32>
    %cst = arith.constant dense<0.000000e+00> : vector<8x128xf32>
    %2 = tpu.matmul %0, %1, %cst {dimension_numbers = #tpu.dot_dimension_numbers<[1], [0], [0], [1], [0, 0, 1, 1], [], []>} : vector<8x32xf32>, vector<32x128xf32>, vector<8x128xf32> -> vector<8x128xf32>
    %cst_3 = arith.constant 0.000000e+00 : f32
    %3 = vector.broadcast %cst_3 : f32 to vector<8x128xf32>
    %4 = arith.maximumf %2, %3 : vector<8x128xf32>
    %c0_4 = arith.constant 0 : index
    %c0_5 = arith.constant 0 : index
    %5 = vector.load %arg3[%c0_4, %c0_5] : memref<128x8xf32, #tpu.memory_space<vmem>>, vector<128x8xf32>
    %cst_6 = arith.constant dense<0.000000e+00> : vector<8x8xf32>
    %6 = tpu.matmul %4, %5, %cst_6 {dimension_numbers = #tpu.dot_dimension_numbers<[1], [0], [0], [1], [0, 0, 1, 1], [], []>} : vector<8x128xf32>, vector<128x8xf32>, vector<8x8xf32> -> vector<8x8xf32>
    %cst_7 = arith.constant dense<0xFF800000> : vector<8xf32>
    %7 = vector.multi_reduction <maximumf>, %6, %cst_7 [1] : vector<8x8xf32> to vector<8xf32>
    %8 = vector.shape_cast %7 : vector<8xf32> to vector<8x1xf32>
    %9 = vector.broadcast %8 : vector<8x1xf32> to vector<8x8xf32>
    %10 = arith.subf %6, %9 : vector<8x8xf32>
    %11 = math.exp %10 : vector<8x8xf32>
    %cst_8 = arith.constant dense<0.000000e+00> : vector<8xf32>
    %12 = vector.multi_reduction <add>, %11, %cst_8 [1] : vector<8x8xf32> to vector<8xf32>
    %13 = vector.shape_cast %12 : vector<8xf32> to vector<8x1xf32>
    %14 = vector.broadcast %13 : vector<8x1xf32> to vector<8x8xf32>
    %15 = arith.divf %11, %14 : vector<8x8xf32>
    %c0_9 = arith.constant 0 : index
    %c0_10 = arith.constant 0 : index
    %16 = vector.load %arg4[%c0_9, %c0_10] : memref<8x8xf32, #tpu.memory_space<vmem>>, vector<8x8xf32>
    tpu.vector_store %arg4[%c0_9, %c0_10], %15 {strides = array<i32>} : memref<8x8xf32, #tpu.memory_space<vmem>>, vector<8x8xf32>,
    return
  }
  func.func @transform_0(%arg0: i32) -> (i32, i32) {
    %c0_i32 = arith.constant 0 : i32
    %c0_i32_0 = arith.constant 0 : i32
    return %arg0, %c0_i32 : i32, i32
  }
  func.func @transform_1(%arg0: i32) -> (i32, i32) {
    %c0_i32 = arith.constant 0 : i32
    %c0_i32_0 = arith.constant 0 : i32
    %c0_i32_1 = arith.constant 0 : i32
    return %c0_i32, %c0_i32_0 : i32, i32
  }
  func.func @transform_2(%arg0: i32) -> (i32, i32) {
    %c0_i32 = arith.constant 0 : i32
    %c0_i32_0 = arith.constant 0 : i32
    %c0_i32_1 = arith.constant 0 : i32
    return %c0_i32, %c0_i32_0 : i32, i32
  }
  func.func @transform_3(%arg0: i32) -> (i32, i32) {
    %c0_i32 = arith.constant 0 : i32
    %c0_i32_0 = arith.constant 0 : i32
    return %arg0, %c0_i32 : i32, i32
  }
}

</mosaic_0001>

<bundles_post_ra>
// kernel: policy_forward.1
= control target key start
LH: loop header
LB: loop body
LE: loop exit
PB: predicated region body
PF: predicated region fallthrough
CT: control target
= control target key end

     0   :  { %v339_v3 = vmov 0.0|0.0   ;;  %vm340_vm0 = vmmov 0   ;;  %v341_v6 = vmov 0.0   ;;  %s441_s0 = inlined_call_operand.vmem [shape: f32[8,32], index: 0, kind: input, shape index: {}]   ;;  %s442_s1 = inlined_call_operand.vmem [shape: f32[32,128], index: 1, kind: input, shape index: {}]   ;;  %s443_s2 = inlined_call_operand.vmem [shape: f32[128,8], index: 2, kind: input, shape index: {}]   ;;  %s444_s3 = inlined_call_operand.hbm [shape: f32[8,8], index: 3, kind: output, shape index: {}]  }
   0x1   :  { %v16_v0 = vld [vmem:[%s442_s1] sm:$0xff]  ;;  %v17_v1 = vld [vmem:[%s442_s1 + $0x8] sm:$0xff]  ;;  %v18_v2 = vld [vmem:[%s442_s1 + $0x10] sm:$0xff]  ;;  %277 = vmatprep.subr.bf16.mxu0 %v339_v3  ;;  %239 = vmatprep.mubr.msk.f32.mxu0 %vm340_vm0, %v341_v6 }
   0x2   :  { %v278_v4 = vpack.c.bf16 %v17_v1, %v16_v0  ;;  %v19_v5 = vld [vmem:[%s442_s1 + $0x18] sm:$0xff]  ;;  %v95_v7 = vld [vmem:[%s443_s2] sm:$0xff]  ;;  %283 = vmatprep.subr.bf16.mxu1 %v339_v3  ;;  %v96_v8 = vld [vmem:[%s443_s2 + $0x8] sm:$0xff]  ;;  %274 = vmatprep.mubr.msk.f32.mxu1 %vm340_vm0, %v341_v6 }
   0x3   :  { %v97_v9 = vld [vmem:[%s443_s2 + $0x10] sm:$0xff]  ;;  %v98_v10 = vld [vmem:[%s443_s2 + $0x18] sm:$0xff]  ;;  %v281_v11 = vpack.c.bf16 %v19_v5, %v18_v2  ;;  %v284_v12 = vpack.c.bf16 %v96_v8, %v95_v7  ;;  %v99_v14 = vld [vmem:[%s443_s2 + $0x20] sm:$0xff] }
   0x4   :  { %279 = vmatpush3.bf16.msra.mxu0 %v278_v4  ;;  %v287_v13 = vpack.c.bf16 %v98_v10, %v97_v9  ;;  %v100_v15 = vld [vmem:[%s443_s2 + $0x28] sm:$0xff] }
   0x5   :  { %280 = vmatprep.subr.bf16.mxu0 %v339_v3  ;;  %285 = vmatpush3.bf16.msra.mxu1 %v284_v12 }
   0x6   :  { %286 = vmatprep.subr.bf16.mxu1 %v339_v3 }
   0x7   :  { %8 = vsyncpa [#allocation3], 0  ;;  %v15_v16 = vld [vmem:[%s441_s0] sm:$0xff]  ;;  %vm20_vm1 = vcmask 261120   ;;  %v290_v17 = vpack.c.bf16 %v100_v15, %v99_v14  ;;  %v101_v18 = vld [vmem:[%s443_s2 + $0x30] sm:$0xff]  ;;  %vm181_vm2 = vcmask 64512  }
   0x8   :  { %282 = vmatpush3.bf16.msra.mxu0 %v281_v11  ;;  %v102_v19 = vld [vmem:[%s443_s2 + $0x38] sm:$0xff]  ;;  %v103_v21 = vld [vmem:[%s443_s2 + $0x40] sm:$0xff]  ;;  %v104_v22 = vld [vmem:[%s443_s2 + $0x48] sm:$0xff] }
   0x9   :  { %288 = vmatpush3.bf16.msra.mxu1 %v287_v13  ;;  %v293_v20 = vpack.c.bf16 %v102_v19, %v101_v18  ;;  %v296_v23 = vpack.c.bf16 %v104_v22, %v103_v21  ;;  %v105_v24 = vld [vmem:[%s443_s2 + $0x50] sm:$0xff]  ;;  %v106_v25 = vld [vmem:[%s443_s2 + $0x58] sm:$0xff]  ;;  %v107_v27 = vld [vmem:[%s443_s2 + $0x60] sm:$0xff] }
   0xa   :  { %289 = vmatprep.subr.bf16.mxu1 %v339_v3  ;;  %v299_v26 = vpack.c.bf16 %v106_v25, %v105_v24  ;;  %v108_v28 = vld [vmem:[%s443_s2 + $0x68] sm:$0xff]  ;;  %v109_v30 = vld [vmem:[%s443_s2 + $0x70] sm:$0xff]  ;;  %v110_v31 = vld [vmem:[%s443_s2 + $0x78] sm:$0xff]  ;;  %s342_s2 = smov [#allocation2]  }
   0xb   :  { %240 = vmatmul.mubr.msk.f32.vlgmr.msra.gmra.mrb[0].mxu0 %vm20_vm1, %v15_v16  ;;  %v302_v29 = vpack.c.bf16 %v108_v28, %v107_v27  ;;  %v305_v32 = vpack.c.bf16 %v110_v31, %v109_v30  ;;  %s200_s25 = sshll.u32 %s342_s2, 4  ;;  %s201_s25 = int_to_ptr.vmem [resolvable:$true] %s200_s25 }
   0xc   :  { %s315_s26 = scalar_lea.vmem %s201_s25, 128  ;;  %p320_p1 = scmp.lt.s32.totalorder %s201_s25, %s201_s25 }
   0xd   :  { %291 = vmatpush3.bf16.msra.mxu1 %v290_v17  ;;  %p316_p0 = scmp.ne.s32.totalorder %s201_s25, %s315_s26  ;;  %p321_p2 = scmp.lt.s32.totalorder %s315_s26, %s315_s26 }
   0xe   :  { %292 = vmatprep.subr.bf16.mxu1 %v339_v3 }
   0xf   :  { %p322_p3 = por %p321_p2, %p320_p1 }
  0x11   :  { %294 = vmatpush3.bf16.msra.mxu1 %v293_v20  ;;  %p323_p4 = pnand %p322_p3, %p316_p0 }
  0x12   :  { %295 = vmatprep.subr.bf16.mxu1 %v339_v3 }
  0x15   :  { %297 = vmatpush3.bf16.msra.mxu1 %v296_v23 }
  0x16   :  { %298 = vmatprep.subr.bf16.mxu1 %v339_v3 }
  0x19   :  { %300 = vmatpush3.bf16.msra.mxu1 %v299_v26 }
  0x1a   :  { %301 = vmatprep.subr.bf16.mxu1 %v339_v3 }
  0x1d   :  { %303 = vmatpush3.bf16.msra.mxu1 %v302_v29 }
  0x1e   :  { %304 = vmatprep.subr.bf16.mxu1 %v339_v3 }
  0x21   :  { %306 = vmatpush3.bf16.msra.mxu1 %v305_v32 }
  0xde   :  { %v90_v33 = vpop.f32.mrb[0].mxu0 }
  0xdf   :  { %v94_v34 = vmax.f32 %v90_v33, 0.0  ;;  %v241_v35 = vpop.f32.mrb[1].mxu0 }
  0xe1   :  { %275 = vmatmul.mubr.f32.vlgmr.msra.gmra.mrb[0].mxu1 %v94_v34 }
 0x1b4   :  { %v177_v36 = vpop.f32.mrb[0].mxu1 }
 0x1b5   :  { %v276_v37 = vpop.f32.mrb[1].mxu1  ;;  %v182_v38 = vsel %vm181_vm2, %v177_v36, -inf }
 0x1b6   :  { %183 = vmax.xlane.f32.xlu0 %v182_v38 }
 0x243   :  { %v184_v39 = vpop.xlane.xlu0 %183 }
 0x244   :  { %v185_v40 = vsub.f32 %v177_v36, %v184_v39 }
 0x246   :  { %v186_v41 = vmul.f32 1.442695, %v185_v40 }
 0x248   :  { %311 = vpow2.f32 %v186_v41 }
 0x252   :  { %v312_v42 = vpop.eup %311 }
 0x253   :  { %v188_v43 = vsel %vm181_vm2, %v312_v42, 0.0 }
 0x254   :  { %189 = vadd.xlane.f32.xlu0 %v188_v43 }
 0x2e1   :  { %v190_v44 = vpop.xlane.xlu0 %189 }
 0x2e2   :  { %313 = vrcp.f32 %v190_v44 }
 0x2ec   :  { %v314_v45 = vpop.eup %313 }
 0x2ed   :  { %v192_v46 = vmul.f32 %v314_v45, %v312_v42 }
 0x2ef   :  { %193 = vst.msk [vmem:[#allocation2] sm:$0xff] %vm181_vm2, %v192_v46 }
 0x2f0   :  { %326 = shalt.err (!%p323_p4)
}
 0x2f1   :  { %s327_s28 = scalar_lea.hbm %s444_s3, 128 }
 0x2f2   :  { %p328_p5 = scmp.ne.s32.totalorder %s444_s3, %s327_s28  ;;  %p331_p6 = scmp.lt.u32.totalorder %s327_s28, %s444_s3 }
 0x2f4   :  { %p333_p7 = pnand %p331_p6, %p328_p5 }
 0x2f6   :  { %336 = shalt.err (!%p333_p7)
}
 0x2f7   :  { %203 = dma.vmem_to_hbm [thread:$0]  %s201_s25, 128, %s444_s3, [#allocation3]  }
 0x2f8   :  { %337 = dma.done.wait [#allocation3], 128  }
 0x2f9   :  { %338 = vsyncadd [#allocation3], 4294967168 }
 0x2fa   :  { %207 = vsyncpa [#allocation3], 1 }

</bundles_post_ra>
